<compile_context>
chip_gen: v7x
topology: tpu7x:2x2x1
jax: 0.10.0
libtpu: 0.0.40
codegen_flags: <defaults>
</compile_context>

<pallas_src>
import functools
from typing import NamedTuple

import jax
import jax.numpy as jnp
from jax.experimental import pallas as pl
from jax.experimental.pallas import tpu as pltpu


def _round_up(x: int, m: int) -> int:
    return (x + m - 1) // m * m


class DinoConfig(NamedTuple):
    in_chans: int
    patch_size: int
    embed_dim: int
    num_patches: int
    num_classes: int
    k_pad: int   # padded C*p*p
    d_pad: int   # padded embed_dim
    c_pad: int   # padded num_classes
    t_pad: int   # padded 1 + num_patches


def make_config(in_chans, patch_size, embed_dim, num_patches, num_classes):
    K = in_chans * patch_size * patch_size
    T = 1 + num_patches
    return DinoConfig(
        in_chans=in_chans, patch_size=patch_size, embed_dim=embed_dim,
        num_patches=num_patches, num_classes=num_classes,
        k_pad=_round_up(K, 128), d_pad=_round_up(embed_dim, 128),
        c_pad=_round_up(num_classes, 128), t_pad=_round_up(T, 8),
    )


@functools.lru_cache(maxsize=1)
def _vmem_limit_bytes() -> int:
    # v5e/v6e: 128 MiB physical VMEM; v7x: 64 MiB.  Scope to ~75% of physical,
    # clamped, with a safe fallback if the query is unavailable.
    try:
        cap = int(pltpu.get_tpu_info().vmem_capacity_bytes)
    except Exception:  # noqa: BLE001 - any failure -> conservative default
        cap = 64 * 1024 * 1024
    return max(32 * 1024 * 1024, min(100 * 1024 * 1024, (cap * 3) // 4))


def _compiler_params():
    return pltpu.CompilerParams(
        dimension_semantics=("parallel",),
        vmem_limit_bytes=_vmem_limit_bytes(),
    )


# ----------------------------------------------------------------------------
# Fused kernel: (rows @ W) + add  ->  LayerNorm  ->  head matmul + bias
# One grid step = tm = bb*T_pad flattened (batch,token) rows.
# ----------------------------------------------------------------------------
def _dino_fused_kernel(x_ref, add_ref, w_ref, g_ref, b_ref, hw_ref, hb_ref,
                       *out_refs, d_real, eps):
    # x_ref:   (tm, K_pad)   bf16  flattened token rows (cls slot rows are zero)
    # add_ref: (tm, D_pad)   f32   per-row additive term (cls/bias + pos embed)
    # w_ref:   (K_pad, D_pad) bf16 patch-embed weight (zero padded)
    # g_ref/b_ref: (1, D_pad) f32  LayerNorm gamma/beta (zero in padded lanes)
    # hw_ref:  (D_pad, C_pad) bf16 head weight; hb_ref: (1, C_pad) f32 head bias
    # out_refs[0]: (tm, C_pad) f32 logits
    # out_refs[1] (optional): (tm, D_pad) f32 normalized backbone tokens
    emb = jnp.dot(x_ref[...], w_ref[...], preferred_element_type=jnp.float32)
    tok = emb + add_ref[...]                                    # (tm, D_pad) f32

    # Two-pass LayerNorm over the d_real valid lanes.  Padded lanes of `tok`
    # are exactly zero, so the sum gives the correct mean; the variance pass
    # masks padded lanes explicitly (avoids E[x^2]-E[x]^2 cancellation).
    inv_d = jnp.float32(1.0 / d_real)
    mu = jnp.sum(tok, axis=-1, keepdims=True) * inv_d
    lane = jax.lax.broadcasted_iota(jnp.int32, (1, tok.shape[-1]), 1)
    mask = (lane < d_real).astype(jnp.float32)
    cen = (tok - mu) * mask
    var = jnp.sum(cen * cen, axis=-1, keepdims=True) * inv_d
    tokn = cen * jax.lax.rsqrt(var + eps) * g_ref[...] + b_ref[...]

    if len(out_refs) > 1:                       # only when backbone feats wanted
        out_refs[1][...] = tokn.astype(out_refs[1].dtype)

    logits = jnp.dot(tokn.astype(jnp.bfloat16), hw_ref[...],
                     preferred_element_type=jnp.float32) + hb_ref[...]
    out_refs[0][...] = logits.astype(out_refs[0].dtype)


def dino_fused_call(x_rows, add_tiled, w, g, b, hw, hb, *, tm, emit_tok,
                    d_real, eps=1e-6):
    rows, K_pad = x_rows.shape
    D_pad = w.shape[1]
    C_pad = hw.shape[1]
    grid = (rows // tm,)

    out_shape = [jax.ShapeDtypeStruct((rows, C_pad), jnp.float32)]
    out_specs = [pl.BlockSpec((tm, C_pad), lambda i: (i, 0))]
    if emit_tok:
        out_shape.append(jax.ShapeDtypeStruct((rows, D_pad), jnp.float32))
        out_specs.append(pl.BlockSpec((tm, D_pad), lambda i: (i, 0)))

    flops = 2 * rows * K_pad * D_pad + 2 * rows * D_pad * C_pad + 8 * rows * D_pad
    bytes_accessed = (rows * K_pad * 2 + K_pad * D_pad * 2 + tm * D_pad * 4
                      + D_pad * C_pad * 2 + rows * C_pad * 4
                      + (rows * D_pad * 4 if emit_tok else 0))

    kernel = functools.partial(_dino_fused_kernel, d_real=d_real, eps=eps)
    outs = pl.pallas_call(
        kernel,
        out_shape=out_shape,
        grid=grid,
        in_specs=[
            pl.BlockSpec((tm, K_pad), lambda i: (i, 0)),      # activation rows
            pl.BlockSpec((tm, D_pad), lambda i: (0, 0)),      # add (resident)
            pl.BlockSpec((K_pad, D_pad), lambda i: (0, 0)),   # patch-embed W
            pl.BlockSpec((1, D_pad), lambda i: (0, 0)),       # gamma
            pl.BlockSpec((1, D_pad), lambda i: (0, 0)),       # beta
            pl.BlockSpec((D_pad, C_pad), lambda i: (0, 0)),   # head W
            pl.BlockSpec((1, C_pad), lambda i: (0, 0)),       # head b
        ],
        out_specs=out_specs,
        compiler_params=_compiler_params(),
        cost_estimate=pl.CostEstimate(flops=int(flops),
                                      transcendentals=int(rows),
                                      bytes_accessed=int(bytes_accessed)),
    )(x_rows, add_tiled, w, g, b, hw, hb)
    logits = outs[0]
    tok = outs[1] if emit_tok else None
    return logits, tok


# ----------------------------------------------------------------------------
# DinoWrapper.forward
# ----------------------------------------------------------------------------
def _pick_batch_tile(B: int, t_pad: int) -> int:
    bb = min(B, max(1, 256 // t_pad))       # target ~256-row M tiles
    if B >= 2:
        bb = max(1, min(bb, B // 2))         # >= 2 grid steps -> both v7x TCs busy
    while B % bb:                            # make it divide B (no row padding)
        bb -= 1
    return bb


@functools.partial(jax.jit, static_argnums=(1, 3, 4))
def dino_wrapper_forward(pparams, cfg: DinoConfig, x, features,
                         return_backbone_features=False):
    B, C, H, W = x.shape
    p = cfg.patch_size
    nh, nw = H // p, W // p
    Np = nh * nw
    K = C * p * p
    T = 1 + Np
    D = cfg.embed_dim
    nc = cfg.num_classes
    K_pad, D_pad, C_pad, T_pad = cfg.k_pad, cfg.d_pad, cfg.c_pad, cfg.t_pad

    # --- patch extraction glue.  Cast to bf16 BEFORE padding; one pad op
    # creates the zero cls-token slot, the T->T_pad rows and the K->K_pad
    # lanes in a single 2-byte-element pass.
    patches = x.reshape(B, C, nh, p, nw, p).transpose(0, 2, 4, 1, 3, 5)
    patches = patches.reshape(B, Np, K).astype(jnp.bfloat16)
    x_tok = jnp.pad(patches, ((0, 0), (1, T_pad - T), (0, K_pad - K)))
    x_rows = x_tok.reshape(B * T_pad, K_pad)     # flatten batch*tokens -> M rows

    bb = _pick_batch_tile(B, T_pad)
    tm = bb * T_pad
    # Per-row additive term repeats every T_pad rows; tile once (tiny) so the
    # kernel sees a resident (tm, D_pad) block.
    add_tiled = jnp.tile(pparams["add"], (bb, 1))

    logits, tok = dino_fused_call(
        x_rows, add_tiled, pparams["patch_w"], pparams["norm_g"],
        pparams["norm_b"], pparams["head_w"], pparams["head_b"],
        tm=tm, emit_tok=return_backbone_features, d_real=D)

    logits = logits.reshape(B, T_pad, C_pad)
    if return_backbone_features:
        tok = tok.reshape(B, T_pad, D_pad)

    if features == "cls":
        out = logits[:, 0, :nc]
        if return_backbone_features:
            return out, tok[:, 0, :D]
        return out
    elif "all" in features:
        out = logits[:, :T, :nc]
        if return_backbone_features:
            return out, tok[:, 1:T, :D]
        return out
    else:  # "patch"
        out = logits[:, 1:T, :nc]
        if return_backbone_features:
            return out, tok[:, 1:T, :D]
        return out


# ----------------------------------------------------------------------------
# Parameters: logical init + one-time padding / bf16 packing
# ----------------------------------------------------------------------------
def init_params(key, in_chans, patch_size, embed_dim, num_patches, num_classes):
    ks = jax.random.split(key, 8)
    patch_dim = in_chans * patch_size * patch_size
    scale = 0.02
    return {
        "patch_w": scale * jax.random.normal(ks[0], (patch_dim, embed_dim), jnp.float32),
        "patch_b": scale * jax.random.normal(ks[1], (embed_dim,), jnp.float32),
        "cls_token": scale * jax.random.normal(ks[2], (1, 1, embed_dim), jnp.float32),
        "pos_embed": scale * jax.random.normal(ks[3], (1, 1 + num_patches, embed_dim), jnp.float32),
        "norm_g": jnp.ones((embed_dim,), jnp.float32),
        "norm_b": jnp.zeros((embed_dim,), jnp.float32),
        # nn.Linear(embed_dim, num_classes): stored already transposed (D, C)
        "head_w": scale * jax.random.normal(ks[4], (embed_dim, num_classes), jnp.float32),
        "head_b": scale * jax.random.normal(ks[5], (num_classes,), jnp.float32),
    }


def pad_params(params, cfg: DinoConfig):
    K = cfg.in_chans * cfg.patch_size ** 2
    D, NC, T = cfg.embed_dim, cfg.num_classes, 1 + cfg.num_patches
    K_pad, D_pad, C_pad, T_pad = cfg.k_pad, cfg.d_pad, cfg.c_pad, cfg.t_pad

    patch_w = jnp.zeros((K_pad, D_pad), jnp.float32).at[:K, :D].set(params["patch_w"])
    # Per-token additive term: row 0 -> cls_token + pos[0]; row t>0 -> patch_b + pos[t]
    pos = params["pos_embed"][0]                                     # (T, D)
    add_real = pos.at[0].add(params["cls_token"][0, 0]).at[1:].add(params["patch_b"])
    add = jnp.zeros((T_pad, D_pad), jnp.float32).at[:T, :D].set(add_real)
    norm_g = jnp.zeros((1, D_pad), jnp.float32).at[0, :D].set(params["norm_g"])
    norm_b = jnp.zeros((1, D_pad), jnp.float32).at[0, :D].set(params["norm_b"])
    head_w = jnp.zeros((D_pad, C_pad), jnp.float32).at[:D, :NC].set(params["head_w"])
    head_b = jnp.zeros((1, C_pad), jnp.float32).at[0, :NC].set(params["head_b"])
    return {
        "patch_w": patch_w.astype(jnp.bfloat16),
        "add": add,
        "norm_g": norm_g,
        "norm_b": norm_b,
        "head_w": head_w.astype(jnp.bfloat16),
        "head_b": head_b,
    }


# ----------------------------------------------------------------------------
# Plain-JAX reference (f32) for a loose numerical check
# ----------------------------------------------------------------------------
def reference_forward(params, x, cfg: DinoConfig, features):
    B, C, H, W = x.shape
    p = cfg.patch_size
    nh, nw = H // p, W // p
    Np = nh * nw
    K = C * p * p
    D = cfg.embed_dim
    patches = x.reshape(B, C, nh, p, nw, p).transpose(0, 2, 4, 1, 3, 5).reshape(B, Np, K)
    emb = patches @ params["patch_w"] + params["patch_b"]
    cls = jnp.broadcast_to(params["cls_token"], (B, 1, D))
    tok = jnp.concatenate([cls, emb], axis=1) + params["pos_embed"]
    mu = tok.mean(-1, keepdims=True)
    var = ((tok - mu) ** 2).mean(-1, keepdims=True)
    tokn = (tok - mu) * jax.lax.rsqrt(var + 1e-6) * params["norm_g"] + params["norm_b"]

    def head(t):
        return t @ params["head_w"] + params["head_b"]

    if features == "cls":
        return head(tokn[:, 0])
    if "all" in features:
        return head(tokn)
    return head(tokn[:, 1:])


# ----------------------------------------------------------------------------
# Main
# ----------------------------------------------------------------------------
if __name__ == "__main__":
    key = jax.random.PRNGKey(0)
    kx, kp = jax.random.split(key)

    B, C, H, W = 2, 4, 16, 16
    patch_size = 8
    embed_dim = 32
    num_classes = 8
    num_patches = (H // patch_size) * (W // patch_size)      # 4

    cfg = make_config(C, patch_size, embed_dim, num_patches, num_classes)
    x = jax.random.normal(kx, (B, C, H, W), jnp.float32)
    params = init_params(kp, C, patch_size, embed_dim, num_patches, num_classes)
    pparams = pad_params(params, cfg)

    out_cls, cls_feats = dino_wrapper_forward(pparams, cfg, x, "cls", True)
    out_patch = dino_wrapper_forward(pparams, cfg, x, "patch", False)
    out_all, patch_feats = dino_wrapper_forward(pparams, cfg, x, "all", True)

    jax.block_until_ready((out_cls, cls_feats, out_patch, out_all, patch_feats))

    assert out_cls.shape == (B, num_classes)
    assert cls_feats.shape == (B, embed_dim)
    assert out_patch.shape == (B, num_patches, num_classes)
    assert out_all.shape == (B, 1 + num_patches, num_classes)
    assert patch_feats.shape == (B, num_patches, embed_dim)

    # Loose numerical check vs f32 reference (kernels use bf16 MXU operands).
    ref_all = reference_forward(params, x, cfg, "all")
    ref_cls = reference_forward(params, x, cfg, "cls")
    ref_patch = reference_forward(params, x, cfg, "patch")
    assert float(jnp.max(jnp.abs(out_all - ref_all))) < 5e-2
    assert float(jnp.max(jnp.abs(out_cls - ref_cls))) < 5e-2
    assert float(jnp.max(jnp.abs(out_patch - ref_patch))) < 5e-2
    assert bool(jnp.all(jnp.isfinite(out_all)))

    print("KERNEL_OK")
</pallas_src>

<mosaic_0001>
module attributes {stable_mosaic.version = 11 : i64} {
  func.func @_dino_fused_kernel(%arg0: i32, %arg1: memref<8x256xbf16, #tpu.memory_space<vmem>>, %arg2: memref<8x128xf32, #tpu.memory_space<vmem>>, %arg3: memref<256x128xbf16, #tpu.memory_space<vmem>>, %arg4: memref<1x128xf32, #tpu.memory_space<vmem>>, %arg5: memref<1x128xf32, #tpu.memory_space<vmem>>, %arg6: memref<128x128xbf16, #tpu.memory_space<vmem>>, %arg7: memref<1x128xf32, #tpu.memory_space<vmem>>, %arg8: memref<8x128xf32, #tpu.memory_space<vmem>>, %arg9: memref<8x128xf32, #tpu.memory_space<vmem>>) attributes {dimension_semantics = [#tpu.dimension_semantics<parallel>], iteration_bounds = array<i64: 2>, scalar_prefetch = 0 : i64, scratch_operands = 0 : i64, tpu.core_type = #tpu.core_type<tc>, window_params = [{transform_indices = @transform_0, window_bounds = array<i64: 8, 256>}, {pipeline_mode = #tpu.pipeline_mode<synchronous>, transform_indices = @transform_1, window_bounds = array<i64: 8, 128>}, {pipeline_mode = #tpu.pipeline_mode<synchronous>, transform_indices = @transform_2, window_bounds = array<i64: 256, 128>}, {pipeline_mode = #tpu.pipeline_mode<synchronous>, transform_indices = @transform_3, window_bounds = array<i64: 1, 128>}, {pipeline_mode = #tpu.pipeline_mode<synchronous>, transform_indices = @transform_4, window_bounds = array<i64: 1, 128>}, {pipeline_mode = #tpu.pipeline_mode<synchronous>, transform_indices = @transform_5, window_bounds = array<i64: 128, 128>}, {pipeline_mode = #tpu.pipeline_mode<synchronous>, transform_indices = @transform_6, window_bounds = array<i64: 1, 128>}, {transform_indices = @transform_7, window_bounds = array<i64: 8, 128>}, {transform_indices = @transform_8, window_bounds = array<i64: 8, 128>}]} {
    %c0 = arith.constant 0 : index
    %c0_0 = arith.constant 0 : index
    %0 = vector.load %arg1[%c0, %c0_0] : memref<8x256xbf16, #tpu.memory_space<vmem>>, vector<8x256xbf16>
    %c0_1 = arith.constant 0 : index
    %c0_2 = arith.constant 0 : index
    %1 = vector.load %arg3[%c0_1, %c0_2] : memref<256x128xbf16, #tpu.memory_space<vmem>>, vector<256x128xbf16>
    %cst = arith.constant dense<0.000000e+00> : vector<8x128xf32>
    %2 = tpu.matmul %0, %1, %cst {dimension_numbers = #tpu.dot_dimension_numbers<[1], [0], [0], [1], [0, 0, 1, 1], [], []>} : vector<8x256xbf16>, vector<256x128xbf16>, vector<8x128xf32> -> vector<8x128xf32>
    %c0_3 = arith.constant 0 : index
    %c0_4 = arith.constant 0 : index
    %3 = vector.load %arg2[%c0_3, %c0_4] : memref<8x128xf32, #tpu.memory_space<vmem>>, vector<8x128xf32>
    %4 = arith.addf %2, %3 : vector<8x128xf32>
    %cst_5 = arith.constant dense<0.000000e+00> : vector<8xf32>
    %5 = vector.multi_reduction <add>, %4, %cst_5 [1] : vector<8x128xf32> to vector<8xf32>
    %6 = vector.shape_cast %5 : vector<8xf32> to vector<8x1xf32>
    %cst_6 = arith.constant 3.125000e-02 : f32
    %7 = vector.broadcast %cst_6 : f32 to vector<8x1xf32>
    %8 = arith.mulf %6, %7 : vector<8x1xf32>
    %9 = tpu.iota {dimensions = array<i32: 1>} : vector<1x128xi32>
    %c32_i32 = arith.constant 32 : i32
    %10 = vector.broadcast %c32_i32 : i32 to vector<1x128xi32>
    %11 = arith.cmpi slt, %9, %10 : vector<1x128xi32>
    %12 = arith.extui %11 : vector<1x128xi1> to vector<1x128xi32>
    %13 = arith.sitofp %12 : vector<1x128xi32> to vector<1x128xf32>
    %14 = vector.broadcast %8 : vector<8x1xf32> to vector<8x128xf32>
    %15 = arith.subf %4, %14 : vector<8x128xf32>
    %16 = vector.broadcast %13 : vector<1x128xf32> to vector<8x128xf32>
    %17 = arith.mulf %15, %16 : vector<8x128xf32>
    %18 = arith.mulf %17, %17 : vector<8x128xf32>
    %cst_7 = arith.constant dense<0.000000e+00> : vector<8xf32>
    %19 = vector.multi_reduction <add>, %18, %cst_7 [1] : vector<8x128xf32> to vector<8xf32>
    %20 = vector.shape_cast %19 : vector<8xf32> to vector<8x1xf32>
    %cst_8 = arith.constant 3.125000e-02 : f32
    %21 = vector.broadcast %cst_8 : f32 to vector<8x1xf32>
    %22 = arith.mulf %20, %21 : vector<8x1xf32>
    %cst_9 = arith.constant 9.99999997E-7 : f32
    %23 = vector.broadcast %cst_9 : f32 to vector<8x1xf32>
    %24 = arith.addf %22, %23 : vector<8x1xf32>
    %25 = math.rsqrt %24 : vector<8x1xf32>
    %26 = vector.broadcast %25 : vector<8x1xf32> to vector<8x128xf32>
    %27 = arith.mulf %17, %26 : vector<8x128xf32>
    %c0_10 = arith.constant 0 : index
    %c0_11 = arith.constant 0 : index
    %28 = vector.load %arg4[%c0_10, %c0_11] : memref<1x128xf32, #tpu.memory_space<vmem>>, vector<1x128xf32>
    %29 = vector.broadcast %28 : vector<1x128xf32> to vector<8x128xf32>
    %30 = arith.mulf %27, %29 : vector<8x128xf32>
    %c0_12 = arith.constant 0 : index
    %c0_13 = arith.constant 0 : index
    %31 = vector.load %arg5[%c0_12, %c0_13] : memref<1x128xf32, #tpu.memory_space<vmem>>, vector<1x128xf32>
    %32 = vector.broadcast %31 : vector<1x128xf32> to vector<8x128xf32>
    %33 = arith.addf %30, %32 : vector<8x128xf32>
    %c0_14 = arith.constant 0 : index
    %c0_15 = arith.constant 0 : index
    %34 = vector.load %arg9[%c0_14, %c0_15] : memref<8x128xf32, #tpu.memory_space<vmem>>, vector<8x128xf32>
    tpu.vector_store %arg9[%c0_14, %c0_15], %33 {strides = array<i32>} : memref<8x128xf32, #tpu.memory_space<vmem>>, vector<8x128xf32>,
    %35 = arith.truncf %33 : vector<8x128xf32> to vector<8x128xbf16>
    %c0_16 = arith.constant 0 : index
    %c0_17 = arith.constant 0 : index
    %36 = vector.load %arg6[%c0_16, %c0_17] : memref<128x128xbf16, #tpu.memory_space<vmem>>, vector<128x128xbf16>
    %cst_18 = arith.constant dense<0.000000e+00> : vector<8x128xf32>
    %37 = tpu.matmul %35, %36, %cst_18 {dimension_numbers = #tpu.dot_dimension_numbers<[1], [0], [0], [1], [0, 0, 1, 1], [], []>} : vector<8x128xbf16>, vector<128x128xbf16>, vector<8x128xf32> -> vector<8x128xf32>
    %c0_19 = arith.constant 0 : index
    %c0_20 = arith.constant 0 : index
    %38 = vector.load %arg7[%c0_19, %c0_20] : memref<1x128xf32, #tpu.memory_space<vmem>>, vector<1x128xf32>
    %39 = vector.broadcast %38 : vector<1x128xf32> to vector<8x128xf32>
    %40 = arith.addf %37, %39 : vector<8x128xf32>
    %c0_21 = arith.constant 0 : index
    %c0_22 = arith.constant 0 : index
    %41 = vector.load %arg8[%c0_21, %c0_22] : memref<8x128xf32, #tpu.memory_space<vmem>>, vector<8x128xf32>
    tpu.vector_store %arg8[%c0_21, %c0_22], %40 {strides = array<i32>} : memref<8x128xf32, #tpu.memory_space<vmem>>, vector<8x128xf32>,
    return
  }
  func.func @transform_0(%arg0: i32) -> (i32, i32) {
    %c0_i32 = arith.constant 0 : i32
    %c0_i32_0 = arith.constant 0 : i32
    return %arg0, %c0_i32 : i32, i32
  }
  func.func @transform_1(%arg0: i32) -> (i32, i32) {
    %c0_i32 = arith.constant 0 : i32
    %c0_i32_0 = arith.constant 0 : i32
    %c0_i32_1 = arith.constant 0 : i32
    return %c0_i32, %c0_i32_0 : i32, i32
  }
  func.func @transform_2(%arg0: i32) -> (i32, i32) {
    %c0_i32 = arith.constant 0 : i32
    %c0_i32_0 = arith.constant 0 : i32
    %c0_i32_1 = arith.constant 0 : i32
    return %c0_i32, %c0_i32_0 : i32, i32
  }
  func.func @transform_3(%arg0: i32) -> (i32, i32) {
    %c0_i32 = arith.constant 0 : i32
    %c0_i32_0 = arith.constant 0 : i32
    %c0_i32_1 = arith.constant 0 : i32
    return %c0_i32, %c0_i32_0 : i32, i32
  }
  func.func @transform_4(%arg0: i32) -> (i32, i32) {
    %c0_i32 = arith.constant 0 : i32
    %c0_i32_0 = arith.constant 0 : i32
    %c0_i32_1 = arith.constant 0 : i32
    return %c0_i32, %c0_i32_0 : i32, i32
  }
  func.func @transform_5(%arg0: i32) -> (i32, i32) {
    %c0_i32 = arith.constant 0 : i32
    %c0_i32_0 = arith.constant 0 : i32
    %c0_i32_1 = arith.constant 0 : i32
    return %c0_i32, %c0_i32_0 : i32, i32
  }
  func.func @transform_6(%arg0: i32) -> (i32, i32) {
    %c0_i32 = arith.constant 0 : i32
    %c0_i32_0 = arith.constant 0 : i32
    %c0_i32_1 = arith.constant 0 : i32
    return %c0_i32, %c0_i32_0 : i32, i32
  }
  func.func @transform_7(%arg0: i32) -> (i32, i32) {
    %c0_i32 = arith.constant 0 : i32
    %c0_i32_0 = arith.constant 0 : i32
    return %arg0, %c0_i32 : i32, i32
  }
  func.func @transform_8(%arg0: i32) -> (i32, i32) {
    %c0_i32 = arith.constant 0 : i32
    %c0_i32_0 = arith.constant 0 : i32
    return %arg0, %c0_i32 : i32, i32
  }
}

</mosaic_0001>

<bundles_post_ra>
// kernel: dino_wrapper_forward.1
= control target key start
LH: loop header
LB: loop body
LE: loop exit
PB: predicated region body
PF: predicated region fallthrough
CT: control target
= control target key end

     0   :  { %s910_s27 = smov 0   ;;  %s1019_s0 = inlined_call_operand.vmem [shape: bf16[16,256], index: 0, kind: input, shape index: {}]   ;;  %s1020_s1 = inlined_call_operand.vmem [shape: f32[8,128], index: 1, kind: input, shape index: {}]   ;;  %s1021_s2 = inlined_call_operand.vmem [shape: bf16[256,128], index: 2, kind: input, shape index: {}]   ;;  %s1022_s3 = inlined_call_operand.vmem [shape: f32[1,128], index: 3, kind: input, shape index: {}]   ;;  %s1023_s4 = inlined_call_operand.vmem [shape: f32[1,128], index: 4, kind: input, shape index: {}]   ;;  %s1024_s5 = inlined_call_operand.vmem [shape: bf16[128,128], index: 5, kind: input, shape index: {}]   ;;  %s1025_s6 = inlined_call_operand.vmem [shape: f32[1,128], index: 6, kind: input, shape index: {}]   ;;  %s1026_s7 = inlined_call_operand.vmem [shape: f32[16,128], index: 7, kind: output, shape index: {0}]   ;;  %s1027_s8 = inlined_call_operand.vmem [shape: f32[16,128], index: 8, kind: output, shape index: {1}]  }
   0x1 LB: > { %s724_s28 = sadd.s32 4294967295, %s861_s27   ;;  %p728_p0 = scmp.ge.s32.totalorder %s861_s27, 1  ;;  %s861_s27 = sphi %s910_s27, %s19_s27  }
   0x2   : > { %p265_p1 = scmp.lt.s32.totalorder %s861_s27, 3 }
   0x4   : > { %p266_p2 = pnand %p728_p0, %p265_p1 }
   0x5   : > { %v827_v0 = vld [vmem:[%s1021_s2 + $0x40] sm:$0xff] (!%p266_p2)   ;;  %v829_v2 = vld [vmem:[%s1021_s2 + $0x48] sm:$0xff] (!%p266_p2)   ;;  %p302_p3 = scmp.lt.s32.totalorder (!%p266_p2), %s724_s28, 1  ;;  %v831_v4 = vld [vmem:[%s1021_s2 + $0x50] sm:$0xff] (!%p266_p2)   ;;  %v863_v26 = vmov (!%p266_p2), 0.0   ;;  %v496_v29 = vlaneseq (!%p266_p2)  ;;  %vm864_vm1 = vmmov (!%p266_p2), 0  }
   0x6   : > { %269 = sbr.rel (%p266_p2) target bundleno = 785 (0x311), region = 48  ;;  %v828_v1 = vld [vmem:[%s1021_s2] sm:$0xff] (!%p266_p2)   ;;  %766 = vmatprep.subr.bf16.mxu0 (!%p266_p2), %v827_v0  ;;  %v830_v3 = vld [vmem:[%s1021_s2 + $0x8] sm:$0xff] (!%p266_p2)   ;;  %v832_v5 = vld [vmem:[%s1021_s2 + $0x10] sm:$0xff] (!%p266_p2)   ;;  %797 = vmatprep.subr.bf16.mxu1 (!%p266_p2), %v863_v26 }
   0x7   : > { %767 = vmatpush3.bf16.msra.mxu0 (!%p266_p2), %v828_v1  ;;  %v833_v6 = vld [vmem:[%s1021_s2 + $0x58] sm:$0xff] (!%p266_p2)   ;;  %v835_v8 = vld [vmem:[%s1021_s2 + $0x60] sm:$0xff] (!%p266_p2)   ;;  %v837_v10 = vld [vmem:[%s1021_s2 + $0x68] sm:$0xff] (!%p266_p2)   ;;  %v497_v30 = vand.u32 (!%p266_p2), 127, %v496_v29  ;;  %813 = vmatprep.mubr.msk.bf16.mxu1 (!%p266_p2), %vm864_vm1, %v863_v26 }
   0x8   : > { %768 = vmatprep.subr.bf16.mxu0 (!%p266_p2), %v829_v2  ;;  %v834_v7 = vld [vmem:[%s1021_s2 + $0x18] sm:$0xff] (!%p266_p2)   ;;  %v836_v9 = vld [vmem:[%s1021_s2 + $0x20] sm:$0xff] (!%p266_p2)   ;;  %v838_v12 = vld [vmem:[%s1021_s2 + $0x28] sm:$0xff] (!%p266_p2)  }
   0x9   : > { %v839_v14 = vld [vmem:[%s1021_s2 + $0x70] sm:$0xff] (!%p266_p2)   ;;  %v841_v16 = vld [vmem:[%s1021_s2 + $0x78] sm:$0xff] (!%p266_p2)   ;;  %v349_v21 = vld [vmem:[%s1020_s1] sm:$0xff] (!%p266_p2)  ;;  %vm498_vm0 = vcmp.lt.s32.totalorder (!%p266_p2), %v497_v30, 32 }
   0xa   : > { %v840_v15 = vld [vmem:[%s1021_s2 + $0x30] sm:$0xff] (!%p266_p2)   ;;  %v842_v17 = vld [vmem:[%s1021_s2 + $0x38] sm:$0xff] (!%p266_p2)   ;;  %v845_v27 = vld [vmem:[%s1024_s5] sm:$0xff] (!%p266_p2)   ;;  %v751_v33 = vsel (!%p266_p2), %vm498_vm0, 1.0, %v863_v26 }
   0xb   : > { %769 = vmatpush3.bf16.msra.mxu0 (!%p266_p2), %v830_v3  ;;  %798 = vmatpush3.bf16.msra.mxu1 (!%p266_p2), %v845_v27  ;;  %v846_v28 = vld [vmem:[%s1024_s5 + $0x8] sm:$0xff] (!%p266_p2)   ;;  %v847_v37 = vld [vmem:[%s1024_s5 + $0x10] sm:$0xff] (!%p266_p2)   ;;  %v848_v38 = vld [vmem:[%s1024_s5 + $0x18] sm:$0xff] (!%p266_p2)  }
   0xc   : > { %770 = vmatprep.subr.bf16.mxu0 (!%p266_p2), %v831_v4  ;;  %799 = vmatprep.subr.bf16.mxu1 (!%p266_p2), %v863_v26  ;;  %v849_v39 = vld [vmem:[%s1024_s5 + $0x20] sm:$0xff] (!%p266_p2)   ;;  %v850_v40 = vld [vmem:[%s1024_s5 + $0x28] sm:$0xff] (!%p266_p2)   ;;  %v851_v41 = vld [vmem:[%s1024_s5 + $0x30] sm:$0xff] (!%p266_p2)  }
   0xd   : > { %s1029_s28 = smov (!%p302_p3, %s724_s28), 1  ;;  %v852_v42 = vld [vmem:[%s1024_s5 + $0x38] sm:$0xff]   ;;  %v752_v47 = vld [vmem:[%s1022_s3] ss:$0 sm:$0xff] }
   0xe   : > { %s939_s21 = sshll.u32 %s1029_s28, 3  ;;  %v753_v49 = vld [vmem:[%s1023_s4] ss:$0 sm:$0xff] }
   0xf   : > { %771 = vmatpush3.bf16.msra.mxu0 %v832_v5  ;;  %s306_s30 = scalar_lea.vmem %s1019_s0, %s939_s21  ;;  %800 = vmatpush3.bf16.msra.mxu1 %v846_v28  ;;  %s314_s29 = scalar_lea.vmem %s1027_s8, %s939_s21  ;;  %v754_v53 = vld [vmem:[%s1025_s6] ss:$0 sm:$0xff] }
  0x10   : > { %772 = vmatprep.subr.bf16.mxu0 %v833_v6  ;;  %v316_v11 = vld [vmem:[%s306_s30] sm:$0xff]  ;;  %801 = vmatprep.subr.bf16.mxu1 %v863_v26  ;;  %s310_s11 = scalar_lea.vmem %s1026_s7, %s939_s21 }
  0x11   : > { %v734_v13 = vcombine.high %v316_v11, %v316_v11  ;;  %v733_v18 = vcombine.low %v316_v11, %v316_v11 }
  0x13   : > { %773 = vmatpush3.bf16.msra.mxu0 %v834_v7  ;;  %485 = vmatprep.mubr.bf16.mxu0 %v734_v13 }
  0x14   : > { %774 = vmatprep.subr.bf16.mxu0 %v835_v8  ;;  %802 = vmatpush3.bf16.msra.mxu1 %v847_v37 }
  0x15   : > { %803 = vmatprep.subr.bf16.mxu1 %v863_v26 }
  0x17   : > { %775 = vmatpush3.bf16.msra.mxu0 %v836_v9 }
  0x18   : > { %776 = vmatprep.subr.bf16.mxu0 %v837_v10  ;;  %804 = vmatpush3.bf16.msra.mxu1 %v848_v38 }
  0x19   : > { %805 = vmatprep.subr.bf16.mxu1 %v863_v26 }
  0x1b   : > { %777 = vmatpush3.bf16.msra.mxu0 %v838_v12 }
  0x1c   : > { %778 = vmatprep.subr.bf16.mxu0 %v839_v14  ;;  %806 = vmatpush3.bf16.msra.mxu1 %v849_v39 }
  0x1d   : > { %807 = vmatprep.subr.bf16.mxu1 %v863_v26 }
  0x1f   : > { %779 = vmatpush3.bf16.msra.mxu0 %v840_v15 }
  0x20   : > { %780 = vmatprep.subr.bf16.mxu0 %v841_v16  ;;  %808 = vmatpush3.bf16.msra.mxu1 %v850_v40 }
  0x21   : > { %809 = vmatprep.subr.bf16.mxu1 %v863_v26 }
  0x23   : > { %781 = vmatpush3.bf16.msra.mxu0 %v842_v17 }
  0x24   : > { %810 = vmatpush3.bf16.msra.mxu1 %v851_v41 }
  0x25   : > { %811 = vmatprep.subr.bf16.mxu1 %v863_v26 }
  0x26   : > { %486 = vmatmul.mubr.bf16.vlgmr.msra.gmra.mrb[0].mxu0 %v733_v18 }
  0x28   : > { %812 = vmatpush3.bf16.msra.mxu1 %v852_v42 }
  0xf9   : > { %v782_v19 = vpop.f32.mrb[0].mxu0 }
  0xfa   : > { %v783_v20 = vpop.f32.mrb[1].mxu0 }
  0xfb   : > { %v784_v22 = vadd.f32 %v783_v20, %v782_v19  ;;  %v785_v23 = vpop.f32.mrb[2].mxu0 }
  0xfc   : > { %v786_v24 = vpop.f32.mrb[3].mxu0 }
  0xfd   : > { %v488_v25 = vadd.f32 %v784_v22, %v349_v21 }
  0xff   : > { %493 = vadd.xlane.f32.xlu0 %v488_v25 }
 0x18c   : > { %v494_v31 = vpop.xlane.xlu0 %493 }
 0x18d   : > { %v495_v32 = vmul.f32 0.03125, %v494_v31 }
 0x18f   : > { %v501_v34 = vsub.f32 %v488_v25, %v495_v32 }
 0x191   : > { %v502_v35 = vmul.f32 %v751_v33, %v501_v34 }
 0x193   : > { %v503_v36 = vmul.f32 %v502_v35, %v502_v35 }
 0x195   : > { %504 = vadd.xlane.f32.xlu0 %v503_v36 }
 0x222   : > { %v505_v43 = vpop.xlane.xlu0 %504 }
 0x223   : > { %v506_v44 = vmul.f32 0.03125, %v505_v43 }
 0x225   : > { %v507_v45 = vadd.f32 1e-06, %v506_v44 }
 0x227   : > { %853 = vrsqrt.f32 %v507_v45 }
 0x231   : > { %v854_v46 = vpop.eup %853 }
 0x232   : > { %v509_v48 = vmul.f32 %v854_v46, %v502_v35 }
 0x234   : > { %v517_v50 = vmul.f32 %v752_v47, %v509_v48 }
 0x236   : > { %v525_v51 = vadd.f32 %v753_v49, %v517_v50 }
 0x238   : > { %526 = vst [vmem:[%s314_s29] sm:$0xff] %v525_v51  ;;  %v527_v52 = vpack.c.bf16 %v525_v51, %v525_v51 }
 0x23a   : > { %814 = vmatmul.mubr.bf16.vlgmr.msra.gmra.mrb[0].mxu1 %v527_v52 }
 0x30d   : > { %v633_v54 = vpop.f32.mrb[0].mxu1 }
 0x30e   : > { %v634_v55 = vadd.f32 %v754_v53, %v633_v54  ;;  %v815_v56 = vpop.f32.mrb[1].mxu1 }
 0x30f   : > { %v636_v57 = vpop.f32.mrb[2].mxu1 }
 0x310   : > { %639 = vst [vmem:[%s310_s11] sm:$0xff] %v634_v55  ;;  %v816_v58 = vpop.f32.mrb[3].mxu1 }
 0x311 PF: > { %s19_s27 = sadd.s32 1, %s861_s27  }
 0x312   : > { %p16_p4 = scmp.ge.s32.totalorder %s19_s27, 4  }
 0x314   :  { %18 = sbr.rel (!%p16_p4) target bundleno = 1 (0x1), region = 90 }

</bundles_post_ra>
